<compile_context>
chip_gen: v6e
topology: v6e:2x2x1
jax: 0.10.0
libtpu: 0.0.40
codegen_flags: <defaults>
</compile_context>

<pallas_src>
import math

import jax
import jax.numpy as jnp
from jax.experimental import pallas as pl
from jax.experimental.pallas import tpu as pltpu

LANE = 128        # vreg lane width: feature dims padded to multiples of 128
SUBLANE_BF16 = 16 # bf16 packs 2 rows per sublane -> keep batch tile % 16 == 0


def _round_up(n, m):
    return (n + m - 1) // m * m


def _cdiv(a, b):
    return (a + b - 1) // b


def decoder_kernel(x_ref, w1_ref, b1_ref, w2_ref, b2_ref, o_ref):
    """relu(relu(x @ w1 + b1) @ w2 + b2) for one (tb, D_in_p) batch tile.

    Matmul operands are bf16 (MXU-native); accumulation and the bias + ReLU
    epilogue stay in f32.  The x f32->bf16 cast happens here (VPU, hidden
    under the MXU/DMA) instead of as a separate XLA pass in the wrapper.
    """
    x = x_ref[...].astype(jnp.bfloat16)                          # (tb, D_in_p)
    h = jnp.dot(x, w1_ref[...], preferred_element_type=jnp.float32)
    h = jnp.maximum(h + b1_ref[...], 0.0)                        # f32 epilogue
    y = jnp.dot(h.astype(jnp.bfloat16), w2_ref[...],
                preferred_element_type=jnp.float32)
    y = jnp.maximum(y + b2_ref[...], 0.0)
    o_ref[...] = y.astype(o_ref.dtype)


def prepare_decoder_params(w1, b1, w2, b2):
    """Pad to lane-dense shapes and cast ONCE (outside the per-call path).

    w1: (D_in, H), w2: (H, D_out)  (i.e. transpose of PyTorch's (out, in)).
    Padded rows/cols and bias entries are zero, so padded hidden/output
    columns stay zero through bias-add + ReLU (exactness relies on ReLU(0)=0).
    """
    D_in, H = w1.shape
    H2, D_out = w2.shape
    assert H2 == H
    D_in_p = _round_up(D_in, LANE)
    H_p = _round_up(H, LANE)
    D_out_p = _round_up(D_out, LANE)

    w1p = jnp.zeros((D_in_p, H_p), jnp.bfloat16).at[:D_in, :H].set(
        w1.astype(jnp.bfloat16))
    b1p = jnp.zeros((1, H_p), jnp.float32).at[:, :H].set(
        jnp.reshape(b1, (1, H)).astype(jnp.float32))
    w2p = jnp.zeros((H_p, D_out_p), jnp.bfloat16).at[:H, :D_out].set(
        w2.astype(jnp.bfloat16))
    b2p = jnp.zeros((1, D_out_p), jnp.float32).at[:, :D_out].set(
        jnp.reshape(b2, (1, D_out)).astype(jnp.float32))

    return {"w1": w1p, "b1": b1p, "w2": w2p, "b2": b2p,
            "d_in": D_in, "h": H, "d_out": D_out}


def _vmem_cap_bytes():
    """Conservative scoped-VMEM ceiling; raised when a 128 MiB chip is seen."""
    try:
        info = pltpu.get_tpu_info()
        phys = getattr(info, "vmem_capacity_bytes", None)
        if phys is not None and phys >= (100 << 20):
            return 100 << 20          # v5e / v6e: 128 MiB physical VMEM
    except Exception:
        pass
    return 48 << 20                   # safe on v7x (64 MiB physical)


def decoder_forward(x, params, *, block_b=256):
    """x: (B, D_in) float; params: output of prepare_decoder_params."""
    B, D_in = x.shape
    assert D_in == params["d_in"]
    w1p, b1p, w2p, b2p = params["w1"], params["b1"], params["w2"], params["b2"]
    D_in_p, H_p = w1p.shape
    D_out_p = w2p.shape[1]
    D_out = params["d_out"]
    out_dtype = x.dtype

    # --- Batch tiling -------------------------------------------------------
    # tb is a multiple of 16 (bf16 sublane packing).  For medium batches cap
    # tb so grid_b >= 2: on v7x the "parallel" axis then spans both
    # TensorCores; on v5e/v6e the extra grid step costs ~0.35us (negligible).
    block_b = _round_up(max(block_b, SUBLANE_BF16), SUBLANE_BF16)
    B_min = _round_up(B, SUBLANE_BF16)
    if B_min >= 2 * SUBLANE_BF16:
        tb = min(block_b, _round_up(_cdiv(B_min, 2), SUBLANE_BF16))
    else:
        tb = B_min
    B_p = _round_up(B, tb)
    grid_b = B_p // tb

    # --- Pad x only if needed (keep original dtype; cast happens in-kernel) --
    if B_p == B and D_in_p == D_in:
        xp = x
    else:
        xp = jnp.zeros((B_p, D_in_p), x.dtype).at[:B, :D_in].set(x)

    # --- Explicit VMEM budget -------------------------------------------------
    x_bytes = tb * D_in_p * jnp.dtype(x.dtype).itemsize
    out_bytes = tb * D_out_p * jnp.dtype(out_dtype).itemsize
    weight_bytes = (w1p.size + w2p.size) * 2 + (b1p.size + b2p.size) * 4
    h_bytes = tb * H_p * 4
    needed = weight_bytes + 2 * x_bytes + 2 * out_bytes + 2 * h_bytes
    vmem_limit = min(max(int(needed * 1.5) + (4 << 20), 32 << 20),
                     _vmem_cap_bytes())

    flops = 2 * B_p * (D_in_p * H_p + H_p * D_out_p)
    bytes_accessed = (xp.size * jnp.dtype(x.dtype).itemsize + weight_bytes
                      + B_p * D_out_p * jnp.dtype(out_dtype).itemsize)

    def build(single_buffer_weights):
        def const_spec(shape):
            # Constant index_map -> operand stays VMEM-resident across the
            # whole batch grid; single-buffer it (nothing to prefetch).
            if single_buffer_weights:
                return pl.BlockSpec(shape, lambda i: (0, 0),
                                    pipeline_mode=pl.Buffered(1))
            return pl.BlockSpec(shape, lambda i: (0, 0))

        return pl.pallas_call(
            decoder_kernel,
            out_shape=jax.ShapeDtypeStruct((B_p, D_out_p), out_dtype),
            grid_spec=pltpu.PrefetchScalarGridSpec(
                num_scalar_prefetch=0,
                grid=(grid_b,),
                in_specs=[
                    pl.BlockSpec((tb, D_in_p), lambda i: (i, 0)),   # x tile
                    const_spec((D_in_p, H_p)),                      # w1 resident
                    const_spec((1, H_p)),                           # b1 resident
                    const_spec((H_p, D_out_p)),                     # w2 resident
                    const_spec((1, D_out_p)),                       # b2 resident
                ],
                out_specs=pl.BlockSpec((tb, D_out_p), lambda i: (i, 0)),
            ),
            compiler_params=pltpu.CompilerParams(
                dimension_semantics=("parallel",),
                vmem_limit_bytes=vmem_limit),
            cost_estimate=pl.CostEstimate(
                flops=flops, transcendentals=0, bytes_accessed=bytes_accessed),
        )

    try:
        out_p = build(True)(xp, w1p, b1p, w2p, b2p)
    except Exception:
        # Fallback: default (double-buffered) specs if Buffered(1) is rejected.
        out_p = build(False)(xp, w1p, b1p, w2p, b2p)

    if B_p == B and D_out_p == D_out:
        return out_p
    return out_p[:B, :D_out]


def init_linear_params(key, fan_in, fan_out):
    """Mirrors torch.nn.Linear default init: U(-1/sqrt(fan_in), 1/sqrt(fan_in)).
    Weight stored pre-transposed as (fan_in, fan_out)."""
    kw, kb = jax.random.split(key)
    bound = 1.0 / math.sqrt(fan_in)
    w = jax.random.uniform(kw, (fan_in, fan_out), jnp.float32, -bound, bound)
    b = jax.random.uniform(kb, (1, fan_out), jnp.float32, -bound, bound)
    return w, b


if __name__ == "__main__":
    # Decoder(D_in, H, D_out) with small demo shapes.
    B, D_in, H, D_out = 8, 16, 32, 64

    key = jax.random.PRNGKey(0)
    k_x, k_l1, k_l2 = jax.random.split(key, 3)

    x = jax.random.normal(k_x, (B, D_in), jnp.float32)
    w1, b1 = init_linear_params(k_l1, D_in, H)
    w2, b2 = init_linear_params(k_l2, H, D_out)

    params = prepare_decoder_params(w1, b1, w2, b2)   # pad + cast once
    out = decoder_forward(x, params)
    out = jax.block_until_ready(out)
    assert out.shape == (B, D_out)

    # Reference mirroring the kernel's bf16-operand / f32-accumulate math.
    h_ref = jnp.maximum(
        jnp.dot(x.astype(jnp.bfloat16), w1.astype(jnp.bfloat16),
                preferred_element_type=jnp.float32) + b1, 0.0)
    ref_q = jnp.maximum(
        jnp.dot(h_ref.astype(jnp.bfloat16), w2.astype(jnp.bfloat16),
                preferred_element_type=jnp.float32) + b2, 0.0)
    assert jnp.allclose(out, ref_q, atol=1e-3, rtol=1e-3)

    # Pure-f32 reference of the original module semantics (loose tolerance
    # accounts for the bf16 matmul operands).
    ref_f32 = jnp.maximum(jnp.maximum(x @ w1 + b1, 0.0) @ w2 + b2, 0.0)
    assert jnp.allclose(out, ref_f32, atol=5e-2, rtol=5e-2)

    print("KERNEL_OK")
</pallas_src>

<mosaic_0001>
module attributes {stable_mosaic.version = 11 : i64} {
  func.func @decoder_kernel(%arg0: i32, %arg1: memref<16x128xf32, #tpu.memory_space<vmem>>, %arg2: memref<128x128xbf16, #tpu.memory_space<vmem>>, %arg3: memref<1x128xf32, #tpu.memory_space<vmem>>, %arg4: memref<128x128xbf16, #tpu.memory_space<vmem>>, %arg5: memref<1x128xf32, #tpu.memory_space<vmem>>, %arg6: memref<16x128xf32, #tpu.memory_space<vmem>>) attributes {dimension_semantics = [#tpu.dimension_semantics<parallel>], iteration_bounds = array<i64: 1>, scalar_prefetch = 0 : i64, scratch_operands = 0 : i64, tpu.core_type = #tpu.core_type<tc>, window_params = [{transform_indices = @transform_0, window_bounds = array<i64: 16, 128>}, {pipeline_mode = #tpu.pipeline_mode<synchronous>, transform_indices = @transform_1, window_bounds = array<i64: 128, 128>}, {pipeline_mode = #tpu.pipeline_mode<synchronous>, transform_indices = @transform_2, window_bounds = array<i64: 1, 128>}, {pipeline_mode = #tpu.pipeline_mode<synchronous>, transform_indices = @transform_3, window_bounds = array<i64: 128, 128>}, {pipeline_mode = #tpu.pipeline_mode<synchronous>, transform_indices = @transform_4, window_bounds = array<i64: 1, 128>}, {transform_indices = @transform_5, window_bounds = array<i64: 16, 128>}]} {
    %c0 = arith.constant 0 : index
    %c0_0 = arith.constant 0 : index
    %0 = vector.load %arg1[%c0, %c0_0] : memref<16x128xf32, #tpu.memory_space<vmem>>, vector<16x128xf32>
    %1 = arith.truncf %0 : vector<16x128xf32> to vector<16x128xbf16>
    %c0_1 = arith.constant 0 : index
    %c0_2 = arith.constant 0 : index
    %2 = vector.load %arg2[%c0_1, %c0_2] : memref<128x128xbf16, #tpu.memory_space<vmem>>, vector<128x128xbf16>
    %cst = arith.constant dense<0.000000e+00> : vector<16x128xf32>
    %3 = tpu.matmul %1, %2, %cst {dimension_numbers = #tpu.dot_dimension_numbers<[1], [0], [0], [1], [0, 0, 1, 1], [], []>} : vector<16x128xbf16>, vector<128x128xbf16>, vector<16x128xf32> -> vector<16x128xf32>
    %c0_3 = arith.constant 0 : index
    %c0_4 = arith.constant 0 : index
    %4 = vector.load %arg3[%c0_3, %c0_4] : memref<1x128xf32, #tpu.memory_space<vmem>>, vector<1x128xf32>
    %5 = vector.broadcast %4 : vector<1x128xf32> to vector<16x128xf32>
    %6 = arith.addf %3, %5 : vector<16x128xf32>
    %cst_5 = arith.constant 0.000000e+00 : f32
    %7 = vector.broadcast %cst_5 : f32 to vector<16x128xf32>
    %8 = arith.maximumf %6, %7 : vector<16x128xf32>
    %9 = arith.truncf %8 : vector<16x128xf32> to vector<16x128xbf16>
    %c0_6 = arith.constant 0 : index
    %c0_7 = arith.constant 0 : index
    %10 = vector.load %arg4[%c0_6, %c0_7] : memref<128x128xbf16, #tpu.memory_space<vmem>>, vector<128x128xbf16>
    %cst_8 = arith.constant dense<0.000000e+00> : vector<16x128xf32>
    %11 = tpu.matmul %9, %10, %cst_8 {dimension_numbers = #tpu.dot_dimension_numbers<[1], [0], [0], [1], [0, 0, 1, 1], [], []>} : vector<16x128xbf16>, vector<128x128xbf16>, vector<16x128xf32> -> vector<16x128xf32>
    %c0_9 = arith.constant 0 : index
    %c0_10 = arith.constant 0 : index
    %12 = vector.load %arg5[%c0_9, %c0_10] : memref<1x128xf32, #tpu.memory_space<vmem>>, vector<1x128xf32>
    %13 = vector.broadcast %12 : vector<1x128xf32> to vector<16x128xf32>
    %14 = arith.addf %11, %13 : vector<16x128xf32>
    %cst_11 = arith.constant 0.000000e+00 : f32
    %15 = vector.broadcast %cst_11 : f32 to vector<16x128xf32>
    %16 = arith.maximumf %14, %15 : vector<16x128xf32>
    %c0_12 = arith.constant 0 : index
    %c0_13 = arith.constant 0 : index
    %17 = vector.load %arg6[%c0_12, %c0_13] : memref<16x128xf32, #tpu.memory_space<vmem>>, vector<16x128xf32>
    tpu.vector_store %arg6[%c0_12, %c0_13], %16 {strides = array<i32>} : memref<16x128xf32, #tpu.memory_space<vmem>>, vector<16x128xf32>,
    return
  }
  func.func @transform_0(%arg0: i32) -> (i32, i32) {
    %c0_i32 = arith.constant 0 : i32
    %c0_i32_0 = arith.constant 0 : i32
    return %arg0, %c0_i32 : i32, i32
  }
  func.func @transform_1(%arg0: i32) -> (i32, i32) {
    %c0_i32 = arith.constant 0 : i32
    %c0_i32_0 = arith.constant 0 : i32
    %c0_i32_1 = arith.constant 0 : i32
    return %c0_i32, %c0_i32_0 : i32, i32
  }
  func.func @transform_2(%arg0: i32) -> (i32, i32) {
    %c0_i32 = arith.constant 0 : i32
    %c0_i32_0 = arith.constant 0 : i32
    %c0_i32_1 = arith.constant 0 : i32
    return %c0_i32, %c0_i32_0 : i32, i32
  }
  func.func @transform_3(%arg0: i32) -> (i32, i32) {
    %c0_i32 = arith.constant 0 : i32
    %c0_i32_0 = arith.constant 0 : i32
    %c0_i32_1 = arith.constant 0 : i32
    return %c0_i32, %c0_i32_0 : i32, i32
  }
  func.func @transform_4(%arg0: i32) -> (i32, i32) {
    %c0_i32 = arith.constant 0 : i32
    %c0_i32_0 = arith.constant 0 : i32
    %c0_i32_1 = arith.constant 0 : i32
    return %c0_i32, %c0_i32_0 : i32, i32
  }
  func.func @transform_5(%arg0: i32) -> (i32, i32) {
    %c0_i32 = arith.constant 0 : i32
    %c0_i32_0 = arith.constant 0 : i32
    return %arg0, %c0_i32 : i32, i32
  }
}

module attributes {stable_mosaic.version = 11 : i64} {
  func.func @decoder_kernel(%arg0: i32, %arg1: memref<16x128xf32, #tpu.memory_space<vmem>>, %arg2: memref<128x128xbf16, #tpu.memory_space<vmem>>, %arg3: memref<1x128xf32, #tpu.memory_space<vmem>>, %arg4: memref<128x128xbf16, #tpu.memory_space<vmem>>, %arg5: memref<1x128xf32, #tpu.memory_space<vmem>>, %arg6: memref<16x128xf32, #tpu.memory_space<vmem>>) attributes {dimension_semantics = [#tpu.dimension_semantics<parallel>], iteration_bounds = array<i64: 1>, scalar_prefetch = 0 : i64, scratch_operands = 0 : i64, tpu.core_type = #tpu.core_type<tc>, window_params = [{transform_indices = @transform_0, window_bounds = array<i64: 16, 128>}, {pipeline_mode = #tpu.pipeline_mode<synchronous>, transform_indices = @transform_1, window_bounds = array<i64: 128, 128>}, {pipeline_mode = #tpu.pipeline_mode<synchronous>, transform_indices = @transform_2, window_bounds = array<i64: 1, 128>}, {pipeline_mode = #tpu.pipeline_mode<synchronous>, transform_indices = @transform_3, window_bounds = array<i64: 128, 128>}, {pipeline_mode = #tpu.pipeline_mode<synchronous>, transform_indices = @transform_4, window_bounds = array<i64: 1, 128>}, {transform_indices = @transform_5, window_bounds = array<i64: 16, 128>}]} {
    %c0 = arith.constant 0 : index
    %c0_0 = arith.constant 0 : index
    %0 = vector.load %arg1[%c0, %c0_0] : memref<16x128xf32, #tpu.memory_space<vmem>>, vector<16x128xf32>
    %1 = arith.truncf %0 : vector<16x128xf32> to vector<16x128xbf16>
    %c0_1 = arith.constant 0 : index
    %c0_2 = arith.constant 0 : index
    %2 = vector.load %arg2[%c0_1, %c0_2] : memref<128x128xbf16, #tpu.memory_space<vmem>>, vector<128x128xbf16>
    %cst = arith.constant dense<0.000000e+00> : vector<16x128xf32>
    %3 = tpu.matmul %1, %2, %cst {dimension_numbers = #tpu.dot_dimension_numbers<[1], [0], [0], [1], [0, 0, 1, 1], [], []>} : vector<16x128xbf16>, vector<128x128xbf16>, vector<16x128xf32> -> vector<16x128xf32>
    %c0_3 = arith.constant 0 : index
    %c0_4 = arith.constant 0 : index
    %4 = vector.load %arg3[%c0_3, %c0_4] : memref<1x128xf32, #tpu.memory_space<vmem>>, vector<1x128xf32>
    %5 = vector.broadcast %4 : vector<1x128xf32> to vector<16x128xf32>
    %6 = arith.addf %3, %5 : vector<16x128xf32>
    %cst_5 = arith.constant 0.000000e+00 : f32
    %7 = vector.broadcast %cst_5 : f32 to vector<16x128xf32>
    %8 = arith.maximumf %6, %7 : vector<16x128xf32>
    %9 = arith.truncf %8 : vector<16x128xf32> to vector<16x128xbf16>
    %c0_6 = arith.constant 0 : index
    %c0_7 = arith.constant 0 : index
    %10 = vector.load %arg4[%c0_6, %c0_7] : memref<128x128xbf16, #tpu.memory_space<vmem>>, vector<128x128xbf16>
    %cst_8 = arith.constant dense<0.000000e+00> : vector<16x128xf32>
    %11 = tpu.matmul %9, %10, %cst_8 {dimension_numbers = #tpu.dot_dimension_numbers<[1], [0], [0], [1], [0, 0, 1, 1], [], []>} : vector<16x128xbf16>, vector<128x128xbf16>, vector<16x128xf32> -> vector<16x128xf32>
    %c0_9 = arith.constant 0 : index
    %c0_10 = arith.constant 0 : index
    %12 = vector.load %arg5[%c0_9, %c0_10] : memref<1x128xf32, #tpu.memory_space<vmem>>, vector<1x128xf32>
    %13 = vector.broadcast %12 : vector<1x128xf32> to vector<16x128xf32>
    %14 = arith.addf %11, %13 : vector<16x128xf32>
    %cst_11 = arith.constant 0.000000e+00 : f32
    %15 = vector.broadcast %cst_11 : f32 to vector<16x128xf32>
    %16 = arith.maximumf %14, %15 : vector<16x128xf32>
    %c0_12 = arith.constant 0 : index
    %c0_13 = arith.constant 0 : index
    %17 = vector.load %arg6[%c0_12, %c0_13] : memref<16x128xf32, #tpu.memory_space<vmem>>, vector<16x128xf32>
    tpu.vector_store %arg6[%c0_12, %c0_13], %16 {strides = array<i32>} : memref<16x128xf32, #tpu.memory_space<vmem>>, vector<16x128xf32>,
    return
  }
  func.func @transform_0(%arg0: i32) -> (i32, i32) {
    %c0_i32 = arith.constant 0 : i32
    %c0_i32_0 = arith.constant 0 : i32
    return %arg0, %c0_i32 : i32, i32
  }
  func.func @transform_1(%arg0: i32) -> (i32, i32) {
    %c0_i32 = arith.constant 0 : i32
    %c0_i32_0 = arith.constant 0 : i32
    %c0_i32_1 = arith.constant 0 : i32
    return %c0_i32, %c0_i32_0 : i32, i32
  }
  func.func @transform_2(%arg0: i32) -> (i32, i32) {
    %c0_i32 = arith.constant 0 : i32
    %c0_i32_0 = arith.constant 0 : i32
    %c0_i32_1 = arith.constant 0 : i32
    return %c0_i32, %c0_i32_0 : i32, i32
  }
  func.func @transform_3(%arg0: i32) -> (i32, i32) {
    %c0_i32 = arith.constant 0 : i32
    %c0_i32_0 = arith.constant 0 : i32
    %c0_i32_1 = arith.constant 0 : i32
    return %c0_i32, %c0_i32_0 : i32, i32
  }
  func.func @transform_4(%arg0: i32) -> (i32, i32) {
    %c0_i32 = arith.constant 0 : i32
    %c0_i32_0 = arith.constant 0 : i32
    %c0_i32_1 = arith.constant 0 : i32
    return %c0_i32, %c0_i32_0 : i32, i32
  }
  func.func @transform_5(%arg0: i32) -> (i32, i32) {
    %c0_i32 = arith.constant 0 : i32
    %c0_i32_0 = arith.constant 0 : i32
    return %arg0, %c0_i32 : i32, i32
  }
}

</mosaic_0001>

<bundles_post_ra>
// kernel: tpu_custom_call.1
= control target key start
LH: loop header
LB: loop body
LE: loop exit
PB: predicated region body
PF: predicated region fallthrough
CT: control target
= control target key end

     0   :  { %10 = vsyncpa [#allocation3], 0  ;;  %s567_s0 = inlined_call_operand.hbm [shape: f32[16,128], index: 0, kind: input, shape index: {}]   ;;  %s568_s1 = inlined_call_operand.hbm [shape: bf16[128,128], index: 1, kind: input, shape index: {}]   ;;  %s569_s2 = inlined_call_operand.vmem [shape: f32[1,128], index: 2, kind: input, shape index: {}]   ;;  %s570_s3 = inlined_call_operand.hbm [shape: bf16[128,128], index: 3, kind: input, shape index: {}]   ;;  %s571_s4 = inlined_call_operand.vmem [shape: f32[1,128], index: 4, kind: input, shape index: {}]   ;;  %s572_s5 = inlined_call_operand.hbm [shape: f32[16,128], index: 5, kind: output, shape index: {}]  }
   0x1   :  { %11 = vsyncpa [#allocation6], 0 }
   0x2   :  { %12 = vsyncpa [#allocation4], 0  ;;  %s503_s18 = smov [#allocation5]  }
   0x3   :  { %s30_s19 = sshll.u32 %s503_s18, 4  ;;  %s31_s19 = int_to_ptr.vmem [resolvable:$true] %s30_s19 }
   0x4   :  { %s425_s20 = scalar_lea.vmem %s31_s19, 1024  ;;  %p430_p1 = scmp.lt.s32.totalorder %s31_s19, %s31_s19 }
   0x5   :  { %p426_p0 = scmp.ne.s32.totalorder %s31_s19, %s425_s20  ;;  %p431_p2 = scmp.lt.s32.totalorder %s425_s20, %s425_s20 }
   0x7   :  { %p432_p3 = por %p431_p2, %p430_p1 }
   0x9   :  { %p433_p4 = pnand %p432_p3, %p426_p0 }
   0xb   :  { %436 = shalt.err (!%p433_p4)
}
   0xc   :  { %s504_s21 = smov 64   ;;  %s505_s22 = smov 4  }
   0xd   :  { %36 = dma.hbm_to_vmem [thread:$0]  %s568_s1, 1024, %s31_s19, [#allocation6], %s504_s21, %s504_s21, %s505_s22  }
   0xe   :  { %s506_s25 = smov [#allocation2]  }
   0xf   :  { %s18_s26 = sshll.u32 %s506_s25, 4  ;;  %s19_s26 = int_to_ptr.vmem [resolvable:$true] %s18_s26 }
  0x10   :  { %s445_s27 = scalar_lea.vmem %s19_s26, 256  ;;  %p450_p6 = scmp.lt.s32.totalorder %s19_s26, %s19_s26 }
  0x11   :  { %p446_p5 = scmp.ne.s32.totalorder %s19_s26, %s445_s27  ;;  %p451_p7 = scmp.lt.s32.totalorder %s445_s27, %s445_s27 }
  0x13   :  { %p452_p8 = por %p451_p7, %p450_p6 }
  0x15   :  { %p453_p9 = pnand %p452_p8, %p446_p5 }
  0x17   :  { %456 = shalt.err (!%p453_p9)
}
  0x18   :  { %s507_s28 = smov 128   ;;  %s508_s29 = smov 8  }
  0x19   :  { %24 = dma.hbm_to_vmem [thread:$0]  %s567_s0, 256, %s19_s26, [#allocation3], %s507_s28, %s507_s28, %s508_s29  }
  0x1a   :  { %s509_s1 = smov [#allocation7]  }
  0x1b   :  { %s44_s7 = sshll.u32 %s509_s1, 4  ;;  %s45_s7 = int_to_ptr.vmem [resolvable:$true] %s44_s7 }
  0x1c   :  { %s465_s8 = scalar_lea.vmem %s45_s7, 1024  ;;  %p470_p11 = scmp.lt.s32.totalorder %s45_s7, %s45_s7 }
  0x1d   :  { %p466_p10 = scmp.ne.s32.totalorder %s45_s7, %s465_s8  ;;  %p471_p12 = scmp.lt.s32.totalorder %s465_s8, %s465_s8 }
  0x1f   :  { %p472_p13 = por %p471_p12, %p470_p11 }
  0x21   :  { %p473_p0 = pnand %p472_p13, %p466_p10 }
  0x23   :  { %476 = shalt.err (!%p473_p0)
}
  0x24   :  { %50 = dma.hbm_to_vmem [thread:$0]  %s570_s3, 1024, %s45_s7, [#allocation6], %s504_s21, %s504_s21, %s505_s22  }
  0x25   :  { %497 = dma.done.wait [#allocation3], 256  }
  0x26   :  { %498 = vsyncadd [#allocation3], 4294967040 }
  0x27   :  { %499 = dma.done.wait [#allocation6], 2048  }
  0x28   :  { %500 = vsyncadd [#allocation6], 4294965248  ;;  %v510_v0 = vmov 0.0   ;;  %vm511_vm0 = vmmov 0   ;;  %v401_v1 = vld [vmem:[#allocation5 + $0x38] sm:$0xff]   ;;  %v402_v2 = vld [vmem:[#allocation5 + $0x30] sm:$0xff]  }
  0x29   :  { %351 = vmatprep.subr.bf16.mxu0 %v510_v0  ;;  %367 = vmatprep.mubr.msk.bf16.mxu0 %vm511_vm0, %v510_v0  ;;  %v403_v3 = vld [vmem:[#allocation5 + $0x28] sm:$0xff]   ;;  %v409_v4 = vld [vmem:[#allocation7 + $0x38] sm:$0xff]   ;;  %v404_v5 = vld [vmem:[#allocation5 + $0x20] sm:$0xff]  }
  0x2a   :  { %371 = vmatprep.subr.bf16.mxu1 %v510_v0  ;;  %387 = vmatprep.mubr.msk.bf16.mxu1 %vm511_vm0, %v510_v0  ;;  %v410_v6 = vld [vmem:[#allocation7 + $0x30] sm:$0xff]   ;;  %v405_v7 = vld [vmem:[#allocation5 + $0x18] sm:$0xff]   ;;  %v411_v8 = vld [vmem:[#allocation7 + $0x28] sm:$0xff]  }
  0x2b   :  { %352 = vmatpush3.bf16.msra.mxu0 %v401_v1  ;;  %372 = vmatpush3.bf16.msra.mxu1 %v409_v4  ;;  %v406_v9 = vld [vmem:[#allocation5 + $0x10] sm:$0xff]   ;;  %v412_v10 = vld [vmem:[#allocation7 + $0x20] sm:$0xff]   ;;  %v407_v11 = vld [vmem:[#allocation5 + $0x8] sm:$0xff]  }
  0x2c   :  { %353 = vmatprep.subr.bf16.mxu0 %v510_v0  ;;  %373 = vmatprep.subr.bf16.mxu1 %v510_v0  ;;  %v413_v12 = vld [vmem:[#allocation7 + $0x18] sm:$0xff]   ;;  %v408_v13 = vld [vmem:[#allocation5] sm:$0xff]   ;;  %v63_v14 = vld [vmem:[#allocation2] sm:$0xff] }
  0x2d   :  { %v64_v15 = vld [vmem:[#allocation2 + $0x8] sm:$0xff]  ;;  %v414_v17 = vld [vmem:[#allocation7 + $0x10] sm:$0xff]   ;;  %v415_v18 = vld [vmem:[#allocation7 + $0x8] sm:$0xff]  }
  0x2e   :  { %v65_v16 = vpack.c.bf16 %v64_v15, %v63_v14  ;;  %v416_v19 = vld [vmem:[#allocation7] sm:$0xff]   ;;  %v315_v20 = vld [vmem:[%s569_s2] ss:$0 sm:$0xff]  ;;  %s512_s2 = smov [#allocation8]  }
  0x2f   :  { %354 = vmatpush3.bf16.msra.mxu0 %v402_v2  ;;  %374 = vmatpush3.bf16.msra.mxu1 %v410_v6  ;;  %v324_v30 = vld [vmem:[%s571_s4] ss:$0 sm:$0xff]  ;;  %s302_s13 = sshll.u32 %s512_s2, 4  ;;  %s303_s13 = int_to_ptr.vmem [resolvable:$true] %s302_s13 }
  0x30   :  { %355 = vmatprep.subr.bf16.mxu0 %v510_v0  ;;  %375 = vmatprep.subr.bf16.mxu1 %v510_v0  ;;  %s477_s14 = scalar_lea.vmem %s303_s13, 256  ;;  %p482_p2 = scmp.lt.s32.totalorder %s303_s13, %s303_s13 }
  0x31   :  { %p478_p1 = scmp.ne.s32.totalorder %s303_s13, %s477_s14  ;;  %p483_p3 = scmp.lt.s32.totalorder %s477_s14, %s477_s14 }
  0x33   :  { %356 = vmatpush3.bf16.msra.mxu0 %v403_v3  ;;  %376 = vmatpush3.bf16.msra.mxu1 %v411_v8  ;;  %p484_p4 = por %p483_p3, %p482_p2 }
  0x34   :  { %357 = vmatprep.subr.bf16.mxu0 %v510_v0  ;;  %377 = vmatprep.subr.bf16.mxu1 %v510_v0 }
  0x35   :  { %p485_p5 = pnand %p484_p4, %p478_p1 }
  0x37   :  { %358 = vmatpush3.bf16.msra.mxu0 %v404_v5  ;;  %378 = vmatpush3.bf16.msra.mxu1 %v412_v10 }
  0x38   :  { %359 = vmatprep.subr.bf16.mxu0 %v510_v0  ;;  %379 = vmatprep.subr.bf16.mxu1 %v510_v0 }
  0x3b   :  { %360 = vmatpush3.bf16.msra.mxu0 %v405_v7  ;;  %380 = vmatpush3.bf16.msra.mxu1 %v413_v12 }
  0x3c   :  { %361 = vmatprep.subr.bf16.mxu0 %v510_v0  ;;  %381 = vmatprep.subr.bf16.mxu1 %v510_v0 }
  0x3f   :  { %362 = vmatpush3.bf16.msra.mxu0 %v406_v9  ;;  %382 = vmatpush3.bf16.msra.mxu1 %v414_v17 }
  0x40   :  { %363 = vmatprep.subr.bf16.mxu0 %v510_v0  ;;  %383 = vmatprep.subr.bf16.mxu1 %v510_v0 }
  0x43   :  { %364 = vmatpush3.bf16.msra.mxu0 %v407_v11  ;;  %384 = vmatpush3.bf16.msra.mxu1 %v415_v18 }
  0x44   :  { %365 = vmatprep.subr.bf16.mxu0 %v510_v0  ;;  %385 = vmatprep.subr.bf16.mxu1 %v510_v0 }
  0x47   :  { %366 = vmatpush3.bf16.msra.mxu0 %v408_v13  ;;  %386 = vmatpush3.bf16.msra.mxu1 %v416_v19 }
  0x4a   :  { %368 = vmatmul.mubr.bf16.vlgmr.msra.gmra.mxu0 %v65_v16 }
 0x10a   :  { %v171_v21 = vpop.f32.mrf.mxu0 }
 0x10b   :  { %v172_v23 = vadd.f32 %v315_v20, %v171_v21 }
 0x10c   :  { %v369_v22 = vpop.f32.mrf.mxu0 }
 0x10d   :  { %v178_v27 = vmax.f32 %v172_v23, 0.0 }
 0x10e   :  { %v174_v24 = vpop.f32.mrf.mxu0 }
 0x10f   :  { %v175_v25 = vadd.f32 %v315_v20, %v174_v24 }
 0x110   :  { %v370_v26 = vpop.f32.mrf.mxu0 }
 0x111   :  { %v179_v28 = vmax.f32 %v175_v25, 0.0 }
 0x113   :  { %v180_v29 = vpack.c.bf16 %v179_v28, %v178_v27 }
 0x115   :  { %388 = vmatmul.mubr.bf16.vlgmr.msra.gmra.mxu1 %v180_v29 }
 0x1d5   :  { %v286_v31 = vpop.f32.mrf.mxu1 }
 0x1d6   :  { %v287_v32 = vadd.f32 %v324_v30, %v286_v31 }
 0x1d7   :  { %v389_v33 = vpop.f32.mrf.mxu1 }
 0x1d8   :  { %v293_v34 = vmax.f32 %v287_v32, 0.0 }
 0x1d9   :  { %v289_v35 = vpop.f32.mrf.mxu1 }
 0x1da   :  { %295 = vst [vmem:[#allocation8] sm:$0xff] %v293_v34  ;;  %v290_v36 = vadd.f32 %v324_v30, %v289_v35 }
 0x1db   :  { %v390_v37 = vpop.f32.mrf.mxu1 }
 0x1dc   :  { %v294_v38 = vmax.f32 %v290_v36, 0.0 }
 0x1de   :  { %296 = vst [vmem:[#allocation8 + $0x8] sm:$0xff] %v294_v38 }
 0x1df   :  { %488 = shalt.err (!%p485_p5)
}
 0x1e0   :  { %308 = dma.vmem_to_hbm [thread:$0]  %s303_s13, 256, %s572_s5, [#allocation4], %s507_s28, %s507_s28, %s508_s29  }
 0x1e1   :  { %501 = dma.done.wait [#allocation4], 256  }
 0x1e2   :  { %502 = vsyncadd [#allocation4], 4294967040 }
 0x1e3   :  { %312 = vsyncpa [#allocation3], 1 }
 0x1e4   :  { %313 = vsyncpa [#allocation6], 1 }
 0x1e5   :  { %314 = vsyncpa [#allocation4], 1 }

// kernel: tpu_custom_call.1
= control target key start
LH: loop header
LB: loop body
LE: loop exit
PB: predicated region body
PF: predicated region fallthrough
CT: control target
= control target key end

     0   :  { %10 = vsyncpa [#allocation3], 0  ;;  %s567_s0 = inlined_call_operand.hbm [shape: f32[16,128], index: 0, kind: input, shape index: {}]   ;;  %s568_s1 = inlined_call_operand.hbm [shape: bf16[128,128], index: 1, kind: input, shape index: {}]   ;;  %s569_s2 = inlined_call_operand.vmem [shape: f32[1,128], index: 2, kind: input, shape index: {}]   ;;  %s570_s3 = inlined_call_operand.hbm [shape: bf16[128,128], index: 3, kind: input, shape index: {}]   ;;  %s571_s4 = inlined_call_operand.vmem [shape: f32[1,128], index: 4, kind: input, shape index: {}]   ;;  %s572_s5 = inlined_call_operand.hbm [shape: f32[16,128], index: 5, kind: output, shape index: {}]  }
   0x1   :  { %11 = vsyncpa [#allocation6], 0 }
   0x2   :  { %12 = vsyncpa [#allocation4], 0  ;;  %s503_s18 = smov [#allocation5]  }
   0x3   :  { %s30_s19 = sshll.u32 %s503_s18, 4  ;;  %s31_s19 = int_to_ptr.vmem [resolvable:$true] %s30_s19 }
   0x4   :  { %s425_s20 = scalar_lea.vmem %s31_s19, 1024  ;;  %p430_p1 = scmp.lt.s32.totalorder %s31_s19, %s31_s19 }
   0x5   :  { %p426_p0 = scmp.ne.s32.totalorder %s31_s19, %s425_s20  ;;  %p431_p2 = scmp.lt.s32.totalorder %s425_s20, %s425_s20 }
   0x7   :  { %p432_p3 = por %p431_p2, %p430_p1 }
   0x9   :  { %p433_p4 = pnand %p432_p3, %p426_p0 }
   0xb   :  { %436 = shalt.err (!%p433_p4)
}
   0xc   :  { %s504_s21 = smov 64   ;;  %s505_s22 = smov 4  }
   0xd   :  { %36 = dma.hbm_to_vmem [thread:$0]  %s568_s1, 1024, %s31_s19, [#allocation6], %s504_s21, %s504_s21, %s505_s22  }
   0xe   :  { %s506_s25 = smov [#allocation2]  }
   0xf   :  { %s18_s26 = sshll.u32 %s506_s25, 4  ;;  %s19_s26 = int_to_ptr.vmem [resolvable:$true] %s18_s26 }
  0x10   :  { %s445_s27 = scalar_lea.vmem %s19_s26, 256  ;;  %p450_p6 = scmp.lt.s32.totalorder %s19_s26, %s19_s26 }
  0x11   :  { %p446_p5 = scmp.ne.s32.totalorder %s19_s26, %s445_s27  ;;  %p451_p7 = scmp.lt.s32.totalorder %s445_s27, %s445_s27 }
  0x13   :  { %p452_p8 = por %p451_p7, %p450_p6 }
  0x15   :  { %p453_p9 = pnand %p452_p8, %p446_p5 }
  0x17   :  { %456 = shalt.err (!%p453_p9)
}
  0x18   :  { %s507_s28 = smov 128   ;;  %s508_s29 = smov 8  }
  0x19   :  { %24 = dma.hbm_to_vmem [thread:$0]  %s567_s0, 256, %s19_s26, [#allocation3], %s507_s28, %s507_s28, %s508_s29  }
  0x1a   :  { %s509_s1 = smov [#allocation7]  }
  0x1b   :  { %s44_s7 = sshll.u32 %s509_s1, 4  ;;  %s45_s7 = int_to_ptr.vmem [resolvable:$true] %s44_s7 }
  0x1c   :  { %s465_s8 = scalar_lea.vmem %s45_s7, 1024  ;;  %p470_p11 = scmp.lt.s32.totalorder %s45_s7, %s45_s7 }
  0x1d   :  { %p466_p10 = scmp.ne.s32.totalorder %s45_s7, %s465_s8  ;;  %p471_p12 = scmp.lt.s32.totalorder %s465_s8, %s465_s8 }
  0x1f   :  { %p472_p13 = por %p471_p12, %p470_p11 }
  0x21   :  { %p473_p0 = pnand %p472_p13, %p466_p10 }
  0x23   :  { %476 = shalt.err (!%p473_p0)
}
  0x24   :  { %50 = dma.hbm_to_vmem [thread:$0]  %s570_s3, 1024, %s45_s7, [#allocation6], %s504_s21, %s504_s21, %s505_s22  }
  0x25   :  { %497 = dma.done.wait [#allocation3], 256  }
  0x26   :  { %498 = vsyncadd [#allocation3], 4294967040 }
  0x27   :  { %499 = dma.done.wait [#allocation6], 2048  }
  0x28   :  { %500 = vsyncadd [#allocation6], 4294965248  ;;  %v510_v0 = vmov 0.0   ;;  %vm511_vm0 = vmmov 0   ;;  %v401_v1 = vld [vmem:[#allocation5 + $0x38] sm:$0xff]   ;;  %v402_v2 = vld [vmem:[#allocation5 + $0x30] sm:$0xff]  }
  0x29   :  { %351 = vmatprep.subr.bf16.mxu0 %v510_v0  ;;  %367 = vmatprep.mubr.msk.bf16.mxu0 %vm511_vm0, %v510_v0  ;;  %v403_v3 = vld [vmem:[#allocation5 + $0x28] sm:$0xff]   ;;  %v409_v4 = vld [vmem:[#allocation7 + $0x38] sm:$0xff]   ;;  %v404_v5 = vld [vmem:[#allocation5 + $0x20] sm:$0xff]  }
  0x2a   :  { %371 = vmatprep.subr.bf16.mxu1 %v510_v0  ;;  %387 = vmatprep.mubr.msk.bf16.mxu1 %vm511_vm0, %v510_v0  ;;  %v410_v6 = vld [vmem:[#allocation7 + $0x30] sm:$0xff]   ;;  %v405_v7 = vld [vmem:[#allocation5 + $0x18] sm:$0xff]   ;;  %v411_v8 = vld [vmem:[#allocation7 + $0x28] sm:$0xff]  }
  0x2b   :  { %352 = vmatpush3.bf16.msra.mxu0 %v401_v1  ;;  %372 = vmatpush3.bf16.msra.mxu1 %v409_v4  ;;  %v406_v9 = vld [vmem:[#allocation5 + $0x10] sm:$0xff]   ;;  %v412_v10 = vld [vmem:[#allocation7 + $0x20] sm:$0xff]   ;;  %v407_v11 = vld [vmem:[#allocation5 + $0x8] sm:$0xff]  }
  0x2c   :  { %353 = vmatprep.subr.bf16.mxu0 %v510_v0  ;;  %373 = vmatprep.subr.bf16.mxu1 %v510_v0  ;;  %v413_v12 = vld [vmem:[#allocation7 + $0x18] sm:$0xff]   ;;  %v408_v13 = vld [vmem:[#allocation5] sm:$0xff]   ;;  %v63_v14 = vld [vmem:[#allocation2] sm:$0xff] }
  0x2d   :  { %v64_v15 = vld [vmem:[#allocation2 + $0x8] sm:$0xff]  ;;  %v414_v17 = vld [vmem:[#allocation7 + $0x10] sm:$0xff]   ;;  %v415_v18 = vld [vmem:[#allocation7 + $0x8] sm:$0xff]  }
  0x2e   :  { %v65_v16 = vpack.c.bf16 %v64_v15, %v63_v14  ;;  %v416_v19 = vld [vmem:[#allocation7] sm:$0xff]   ;;  %v315_v20 = vld [vmem:[%s569_s2] ss:$0 sm:$0xff]  ;;  %s512_s2 = smov [#allocation8]  }
  0x2f   :  { %354 = vmatpush3.bf16.msra.mxu0 %v402_v2  ;;  %374 = vmatpush3.bf16.msra.mxu1 %v410_v6  ;;  %v324_v30 = vld [vmem:[%s571_s4] ss:$0 sm:$0xff]  ;;  %s302_s13 = sshll.u32 %s512_s2, 4  ;;  %s303_s13 = int_to_ptr.vmem [resolvable:$true] %s302_s13 }
  0x30   :  { %355 = vmatprep.subr.bf16.mxu0 %v510_v0  ;;  %375 = vmatprep.subr.bf16.mxu1 %v510_v0  ;;  %s477_s14 = scalar_lea.vmem %s303_s13, 256  ;;  %p482_p2 = scmp.lt.s32.totalorder %s303_s13, %s303_s13 }
  0x31   :  { %p478_p1 = scmp.ne.s32.totalorder %s303_s13, %s477_s14  ;;  %p483_p3 = scmp.lt.s32.totalorder %s477_s14, %s477_s14 }
  0x33   :  { %356 = vmatpush3.bf16.msra.mxu0 %v403_v3  ;;  %376 = vmatpush3.bf16.msra.mxu1 %v411_v8  ;;  %p484_p4 = por %p483_p3, %p482_p2 }
  0x34   :  { %357 = vmatprep.subr.bf16.mxu0 %v510_v0  ;;  %377 = vmatprep.subr.bf16.mxu1 %v510_v0 }
  0x35   :  { %p485_p5 = pnand %p484_p4, %p478_p1 }
  0x37   :  { %358 = vmatpush3.bf16.msra.mxu0 %v404_v5  ;;  %378 = vmatpush3.bf16.msra.mxu1 %v412_v10 }
  0x38   :  { %359 = vmatprep.subr.bf16.mxu0 %v510_v0  ;;  %379 = vmatprep.subr.bf16.mxu1 %v510_v0 }
  0x3b   :  { %360 = vmatpush3.bf16.msra.mxu0 %v405_v7  ;;  %380 = vmatpush3.bf16.msra.mxu1 %v413_v12 }
  0x3c   :  { %361 = vmatprep.subr.bf16.mxu0 %v510_v0  ;;  %381 = vmatprep.subr.bf16.mxu1 %v510_v0 }
  0x3f   :  { %362 = vmatpush3.bf16.msra.mxu0 %v406_v9  ;;  %382 = vmatpush3.bf16.msra.mxu1 %v414_v17 }
  0x40   :  { %363 = vmatprep.subr.bf16.mxu0 %v510_v0  ;;  %383 = vmatprep.subr.bf16.mxu1 %v510_v0 }
  0x43   :  { %364 = vmatpush3.bf16.msra.mxu0 %v407_v11  ;;  %384 = vmatpush3.bf16.msra.mxu1 %v415_v18 }
  0x44   :  { %365 = vmatprep.subr.bf16.mxu0 %v510_v0  ;;  %385 = vmatprep.subr.bf16.mxu1 %v510_v0 }
  0x47   :  { %366 = vmatpush3.bf16.msra.mxu0 %v408_v13  ;;  %386 = vmatpush3.bf16.msra.mxu1 %v416_v19 }
  0x4a   :  { %368 = vmatmul.mubr.bf16.vlgmr.msra.gmra.mxu0 %v65_v16 }
 0x10a   :  { %v171_v21 = vpop.f32.mrf.mxu0 }
 0x10b   :  { %v172_v23 = vadd.f32 %v315_v20, %v171_v21 }
 0x10c   :  { %v369_v22 = vpop.f32.mrf.mxu0 }
 0x10d   :  { %v178_v27 = vmax.f32 %v172_v23, 0.0 }
 0x10e   :  { %v174_v24 = vpop.f32.mrf.mxu0 }
 0x10f   :  { %v175_v25 = vadd.f32 %v315_v20, %v174_v24 }
 0x110   :  { %v370_v26 = vpop.f32.mrf.mxu0 }
 0x111   :  { %v179_v28 = vmax.f32 %v175_v25, 0.0 }
 0x113   :  { %v180_v29 = vpack.c.bf16 %v179_v28, %v178_v27 }
 0x115   :  { %388 = vmatmul.mubr.bf16.vlgmr.msra.gmra.mxu1 %v180_v29 }
 0x1d5   :  { %v286_v31 = vpop.f32.mrf.mxu1 }
 0x1d6   :  { %v287_v32 = vadd.f32 %v324_v30, %v286_v31 }
 0x1d7   :  { %v389_v33 = vpop.f32.mrf.mxu1 }
 0x1d8   :  { %v293_v34 = vmax.f32 %v287_v32, 0.0 }
 0x1d9   :  { %v289_v35 = vpop.f32.mrf.mxu1 }
 0x1da   :  { %295 = vst [vmem:[#allocation8] sm:$0xff] %v293_v34  ;;  %v290_v36 = vadd.f32 %v324_v30, %v289_v35 }
 0x1db   :  { %v390_v37 = vpop.f32.mrf.mxu1 }
 0x1dc   :  { %v294_v38 = vmax.f32 %v290_v36, 0.0 }
 0x1de   :  { %296 = vst [vmem:[#allocation8 + $0x8] sm:$0xff] %v294_v38 }
 0x1df   :  { %488 = shalt.err (!%p485_p5)
}
 0x1e0   :  { %308 = dma.vmem_to_hbm [thread:$0]  %s303_s13, 256, %s572_s5, [#allocation4], %s507_s28, %s507_s28, %s508_s29  }
 0x1e1   :  { %501 = dma.done.wait [#allocation4], 256  }
 0x1e2   :  { %502 = vsyncadd [#allocation4], 4294967040 }
 0x1e3   :  { %312 = vsyncpa [#allocation3], 1 }
 0x1e4   :  { %313 = vsyncpa [#allocation6], 1 }
 0x1e5   :  { %314 = vsyncpa [#allocation4], 1 }

</bundles_post_ra>
